<compile_context>
chip_gen: v5e
topology: v5e:2x2
jax: 0.10.0
libtpu: 0.0.40
codegen_flags: <defaults>
</compile_context>

<pallas_src>
import jax
import jax.numpy as jnp
import numpy as np
from jax.experimental import pallas as pl
from jax.experimental.pallas import tpu as pltpu


F_IN = 99          # raw input feature width
ENC_D = 10
DEC_D = 99
CLF_D = 1
DEC1_D = 32        # decoder first-layer width inside the fused 52-wide block
FUSED_D = 52       # 32 (dec.l1) + 20 (clf.l1)


# ---------------------------------------------------------------------------
# Kernel
# ---------------------------------------------------------------------------
def _autoencoder_kernel(
    x_ref,                                                     # [TB, 99] f32
    we1_ref, be1_ref, we2_ref, be2_ref, we3_ref, be3_ref,      # encoder (W bf16, b f32)
    wdc1_ref, bdc1_ref,                                        # fused dec.l1|clf.l1 [10,52]
    wd2_ref, bd2_ref, wd3_ref, bd3_ref,                        # decoder tail (wd2 row-padded [52,54])
    wc2_ref, bc2_ref,                                          # classifier tail (wc2 row-padded [52,1])
    enc_ref, dec_ref, clf_ref,                                 # [TB,10] [TB,99] [TB,1]
):
    x = x_ref[...].astype(jnp.bfloat16)

    # ---- encoder: Linear(99,54) Tanh Linear(54,32) Tanh Linear(32,10) ----
    h = jnp.tanh(
        jnp.dot(x, we1_ref[...], preferred_element_type=jnp.float32) + be1_ref[...]
    )
    h = jnp.tanh(
        jnp.dot(h.astype(jnp.bfloat16), we2_ref[...],
                preferred_element_type=jnp.float32) + be2_ref[...]
    )
    enc = (
        jnp.dot(h.astype(jnp.bfloat16), we3_ref[...],
                preferred_element_type=jnp.float32) + be3_ref[...]
    )

    # ---- fused first layers: dec Linear(10,32)+Tanh | clf Linear(10,20)+ReLU ----
    # Full-width lane-masked activation instead of sub-128 lane slicing.
    enc_bf = enc.astype(jnp.bfloat16)
    dc = (
        jnp.dot(enc_bf, wdc1_ref[...], preferred_element_type=jnp.float32)
        + bdc1_ref[...]
    )
    lane = jax.lax.broadcasted_iota(jnp.int32, dc.shape, 1)
    act = jnp.where(lane < DEC1_D, jnp.tanh(dc), jnp.maximum(dc, 0.0))
    act_bf = act.astype(jnp.bfloat16)

    # ---- decoder tail: Linear(32,54) Tanh Linear(54,99) ReLU ----
    # wd2 is row-zero-padded to [52,54]: rows 32..51 are 0, so relu lanes drop out.
    d = jnp.tanh(
        jnp.dot(act_bf, wd2_ref[...], preferred_element_type=jnp.float32)
        + bd2_ref[...]
    )
    dec = jnp.maximum(
        jnp.dot(d.astype(jnp.bfloat16), wd3_ref[...],
                preferred_element_type=jnp.float32) + bd3_ref[...],
        0.0,
    )

    # ---- classifier tail: Linear(20,1) Sigmoid ----
    # wc2 is row-zero-padded to [52,1]: rows 0..31 are 0, so tanh lanes drop out.
    clf = jax.nn.sigmoid(
        jnp.dot(act_bf, wc2_ref[...], preferred_element_type=jnp.float32)
        + bc2_ref[...]
    )

    enc_ref[...] = enc.astype(enc_ref.dtype)
    dec_ref[...] = dec.astype(dec_ref.dtype)
    clf_ref[...] = clf.astype(clf_ref.dtype)


# ---------------------------------------------------------------------------
# Tile / VMEM selection
# ---------------------------------------------------------------------------
def _round_up(v, m):
    return ((v + m - 1) // m) * m


def _choose_batch_tile(B, max_tile):
    if B < 16:
        return B  # tiny batch: one full block (block dim == array dim is legal)
    # Keep >=2 grid steps so v7x's 2 TCs both get work under "parallel";
    # tile a multiple of 8, capped at max_tile.
    tb = min(max_tile, _round_up(pl.cdiv(B, 2), 8))
    return max(8, min(tb, _round_up(B, 8)))


def _vmem_limit_bytes(tb):
    # ~10-12 [TB,128]-equivalent f32 live slabs (temps + double-buffered I/O)
    # plus small weights; x2 headroom, clamped to [16 MiB, 48 MiB] (v7x-safe).
    est = 4 * tb * 128 * 12 + (2 << 20)
    return int(min(max(2 * est, 16 << 20), 48 << 20))


# ---------------------------------------------------------------------------
# Host-side one-time parameter prep (cache the result per parameter set)
# ---------------------------------------------------------------------------
def prepare_params(p):
    """Fuse dec.l1|clf.l1, zero-pad wd2/wc2 rows, cast weights to bf16. Biases stay f32."""
    wdc1 = jnp.concatenate([p["wd1"], p["wc1"]], axis=1)                 # [10, 52]
    bdc1 = jnp.concatenate([p["bd1"], p["bc1"]], axis=1)                 # [1, 52]
    wd2p = jnp.concatenate(
        [p["wd2"], jnp.zeros((FUSED_D - DEC1_D, 54), jnp.float32)], axis=0
    )                                                                    # [52, 54]
    wc2p = jnp.concatenate(
        [jnp.zeros((DEC1_D, 1), jnp.float32), p["wc2"]], axis=0
    )                                                                    # [52, 1]

    bf = lambda w: w.astype(jnp.bfloat16)
    return {
        "we1": bf(p["we1"]), "be1": p["be1"],
        "we2": bf(p["we2"]), "be2": p["be2"],
        "we3": bf(p["we3"]), "be3": p["be3"],
        "wdc1": bf(wdc1), "bdc1": bdc1,
        "wd2": bf(wd2p), "bd2": p["bd2"],
        "wd3": bf(p["wd3"]), "bd3": p["bd3"],
        "wc2": bf(wc2p), "bc2": p["bc2"],
    }


# ---------------------------------------------------------------------------
# Wrapper
# ---------------------------------------------------------------------------
def my_autoencoder_forward(x, prepped, *, batch_tile=1024):
    """x: [B, 99] float32. prepped: output of prepare_params()."""
    B, F = x.shape
    assert F == F_IN

    weight_args = [
        prepped["we1"], prepped["be1"], prepped["we2"], prepped["be2"],
        prepped["we3"], prepped["be3"],
        prepped["wdc1"], prepped["bdc1"],
        prepped["wd2"], prepped["bd2"], prepped["wd3"], prepped["bd3"],
        prepped["wc2"], prepped["bc2"],
    ]

    TB = _choose_batch_tile(B, batch_tile)
    grid = (pl.cdiv(B, TB),)

    def full_spec(arr):
        # Whole (tiny) parameter array; constant index_map -> fetched once.
        return pl.BlockSpec(arr.shape, lambda i: (0, 0))

    in_specs = [pl.BlockSpec((TB, F_IN), lambda i: (i, 0))] + [
        full_spec(a) for a in weight_args
    ]
    out_specs = [
        pl.BlockSpec((TB, ENC_D), lambda i: (i, 0)),
        pl.BlockSpec((TB, DEC_D), lambda i: (i, 0)),
        pl.BlockSpec((TB, CLF_D), lambda i: (i, 0)),
    ]
    out_shape = (
        jax.ShapeDtypeStruct((B, ENC_D), jnp.float32),
        jax.ShapeDtypeStruct((B, DEC_D), jnp.float32),
        jax.ShapeDtypeStruct((B, CLF_D), jnp.float32),
    )

    fn = pl.pallas_call(
        _autoencoder_kernel,
        grid_spec=pltpu.PrefetchScalarGridSpec(
            num_scalar_prefetch=0,
            grid=grid,
            in_specs=in_specs,
            out_specs=out_specs,
        ),
        out_shape=out_shape,
        compiler_params=pltpu.CompilerParams(
            dimension_semantics=("parallel",),
            vmem_limit_bytes=_vmem_limit_bytes(TB),
        ),
    )
    enc, dec, clf = fn(x, *weight_args)
    return enc, dec, clf


# ---------------------------------------------------------------------------
# Deterministic parameter init (PyTorch nn.Linear-style uniform bounds)
# ---------------------------------------------------------------------------
def init_params(key):
    dims = {
        # name: (fan_in, fan_out)
        "e1": (99, 54), "e2": (54, 32), "e3": (32, 10),
        "d1": (10, 32), "d2": (32, 54), "d3": (54, 99),
        "c1": (10, 20), "c2": (20, 1),
    }
    params = {}
    for name, (fin, fout) in dims.items():
        key, kw, kb = jax.random.split(key, 3)
        bound = 1.0 / np.sqrt(fin)
        # W stored as [in, out]  (transposed vs. PyTorch's [out, in])
        params["w" + name] = jax.random.uniform(
            kw, (fin, fout), jnp.float32, -bound, bound
        )
        params["b" + name] = jax.random.uniform(
            kb, (1, fout), jnp.float32, -bound, bound
        )
    return params


# Pure-JAX f32 reference for correctness checking.
def reference_forward(x, p):
    h = jnp.tanh(x @ p["we1"] + p["be1"])
    h = jnp.tanh(h @ p["we2"] + p["be2"])
    enc = h @ p["we3"] + p["be3"]
    d = jnp.tanh(enc @ p["wd1"] + p["bd1"])
    d = jnp.tanh(d @ p["wd2"] + p["bd2"])
    dec = jnp.maximum(d @ p["wd3"] + p["bd3"], 0.0)
    c = jnp.maximum(enc @ p["wc1"] + p["bc1"], 0.0)
    clf = jax.nn.sigmoid(c @ p["wc2"] + p["bc2"])
    return enc, dec, clf


if __name__ == "__main__":
    key = jax.random.PRNGKey(0)
    kx, kp = jax.random.split(key)

    B = 64  # small test batch; tile logic gives TB=32, grid=2 steps (both TCs busy)
    x = jax.random.normal(kx, (B, F_IN), jnp.float32)
    params = init_params(kp)

    prepped = prepare_params(params)          # one-time host-side weight prep
    fwd = jax.jit(my_autoencoder_forward)     # single traced program per shape

    enc, dec, clf = fwd(x, prepped)
    jax.block_until_ready((enc, dec, clf))

    # sanity check vs pure-JAX f32 reference (tolerance relaxed for bf16 MXU operands)
    enc_r, dec_r, clf_r = reference_forward(x, params)
    np.testing.assert_allclose(np.asarray(enc), np.asarray(enc_r), atol=5e-2, rtol=5e-2)
    np.testing.assert_allclose(np.asarray(dec), np.asarray(dec_r), atol=5e-2, rtol=5e-2)
    np.testing.assert_allclose(np.asarray(clf), np.asarray(clf_r), atol=5e-2, rtol=5e-2)

    assert enc.shape == (B, ENC_D) and dec.shape == (B, DEC_D) and clf.shape == (B, CLF_D)
    print("KERNEL_OK")
</pallas_src>

<mosaic_0001>
module attributes {stable_mosaic.version = 11 : i64} {
  func.func @_autoencoder_kernel(%arg0: i32, %arg1: memref<32x99xf32, #tpu.memory_space<vmem>>, %arg2: memref<99x54xbf16, #tpu.memory_space<vmem>>, %arg3: memref<1x54xf32, #tpu.memory_space<vmem>>, %arg4: memref<54x32xbf16, #tpu.memory_space<vmem>>, %arg5: memref<1x32xf32, #tpu.memory_space<vmem>>, %arg6: memref<32x10xbf16, #tpu.memory_space<vmem>>, %arg7: memref<1x10xf32, #tpu.memory_space<vmem>>, %arg8: memref<10x52xbf16, #tpu.memory_space<vmem>>, %arg9: memref<1x52xf32, #tpu.memory_space<vmem>>, %arg10: memref<52x54xbf16, #tpu.memory_space<vmem>>, %arg11: memref<1x54xf32, #tpu.memory_space<vmem>>, %arg12: memref<54x99xbf16, #tpu.memory_space<vmem>>, %arg13: memref<1x99xf32, #tpu.memory_space<vmem>>, %arg14: memref<52x1xbf16, #tpu.memory_space<vmem>>, %arg15: memref<1x1xf32, #tpu.memory_space<vmem>>, %arg16: memref<32x10xf32, #tpu.memory_space<vmem>>, %arg17: memref<32x99xf32, #tpu.memory_space<vmem>>, %arg18: memref<32x1xf32, #tpu.memory_space<vmem>>) attributes {dimension_semantics = [#tpu.dimension_semantics<parallel>], iteration_bounds = array<i64: 2>, scalar_prefetch = 0 : i64, scratch_operands = 0 : i64, tpu.core_type = #tpu.core_type<tc>, window_params = [{transform_indices = @transform_0, window_bounds = array<i64: 32, 99>}, {pipeline_mode = #tpu.pipeline_mode<synchronous>, transform_indices = @transform_1, window_bounds = array<i64: 99, 54>}, {pipeline_mode = #tpu.pipeline_mode<synchronous>, transform_indices = @transform_2, window_bounds = array<i64: 1, 54>}, {pipeline_mode = #tpu.pipeline_mode<synchronous>, transform_indices = @transform_3, window_bounds = array<i64: 54, 32>}, {pipeline_mode = #tpu.pipeline_mode<synchronous>, transform_indices = @transform_4, window_bounds = array<i64: 1, 32>}, {pipeline_mode = #tpu.pipeline_mode<synchronous>, transform_indices = @transform_5, window_bounds = array<i64: 32, 10>}, {pipeline_mode = #tpu.pipeline_mode<synchronous>, transform_indices = @transform_6, window_bounds = array<i64: 1, 10>}, {pipeline_mode = #tpu.pipeline_mode<synchronous>, transform_indices = @transform_7, window_bounds = array<i64: 10, 52>}, {pipeline_mode = #tpu.pipeline_mode<synchronous>, transform_indices = @transform_8, window_bounds = array<i64: 1, 52>}, {pipeline_mode = #tpu.pipeline_mode<synchronous>, transform_indices = @transform_9, window_bounds = array<i64: 52, 54>}, {pipeline_mode = #tpu.pipeline_mode<synchronous>, transform_indices = @transform_10, window_bounds = array<i64: 1, 54>}, {pipeline_mode = #tpu.pipeline_mode<synchronous>, transform_indices = @transform_11, window_bounds = array<i64: 54, 99>}, {pipeline_mode = #tpu.pipeline_mode<synchronous>, transform_indices = @transform_12, window_bounds = array<i64: 1, 99>}, {pipeline_mode = #tpu.pipeline_mode<synchronous>, transform_indices = @transform_13, window_bounds = array<i64: 52, 1>}, {pipeline_mode = #tpu.pipeline_mode<synchronous>, transform_indices = @transform_14, window_bounds = array<i64: 1, 1>}, {transform_indices = @transform_15, window_bounds = array<i64: 32, 10>}, {transform_indices = @transform_16, window_bounds = array<i64: 32, 99>}, {transform_indices = @transform_17, window_bounds = array<i64: 32, 1>}]} {
    %c0 = arith.constant 0 : index
    %c0_0 = arith.constant 0 : index
    %0 = vector.load %arg1[%c0, %c0_0] : memref<32x99xf32, #tpu.memory_space<vmem>>, vector<32x99xf32>
    %1 = arith.truncf %0 : vector<32x99xf32> to vector<32x99xbf16>
    %c0_1 = arith.constant 0 : index
    %c0_2 = arith.constant 0 : index
    %2 = vector.load %arg2[%c0_1, %c0_2] : memref<99x54xbf16, #tpu.memory_space<vmem>>, vector<99x54xbf16>
    %cst = arith.constant dense<0.000000e+00> : vector<32x54xf32>
    %3 = tpu.matmul %1, %2, %cst {dimension_numbers = #tpu.dot_dimension_numbers<[1], [0], [0], [1], [0, 0, 1, 1], [], []>} : vector<32x99xbf16>, vector<99x54xbf16>, vector<32x54xf32> -> vector<32x54xf32>
    %c0_3 = arith.constant 0 : index
    %c0_4 = arith.constant 0 : index
    %4 = vector.load %arg3[%c0_3, %c0_4] : memref<1x54xf32, #tpu.memory_space<vmem>>, vector<1x54xf32>
    %5 = vector.broadcast %4 : vector<1x54xf32> to vector<32x54xf32>
    %6 = arith.addf %3, %5 : vector<32x54xf32>
    %7 = math.tanh %6 : vector<32x54xf32>
    %8 = arith.truncf %7 : vector<32x54xf32> to vector<32x54xbf16>
    %c0_5 = arith.constant 0 : index
    %c0_6 = arith.constant 0 : index
    %9 = vector.load %arg4[%c0_5, %c0_6] : memref<54x32xbf16, #tpu.memory_space<vmem>>, vector<54x32xbf16>
    %cst_7 = arith.constant dense<0.000000e+00> : vector<32x32xf32>
    %10 = tpu.matmul %8, %9, %cst_7 {dimension_numbers = #tpu.dot_dimension_numbers<[1], [0], [0], [1], [0, 0, 1, 1], [], []>} : vector<32x54xbf16>, vector<54x32xbf16>, vector<32x32xf32> -> vector<32x32xf32>
    %c0_8 = arith.constant 0 : index
    %c0_9 = arith.constant 0 : index
    %11 = vector.load %arg5[%c0_8, %c0_9] : memref<1x32xf32, #tpu.memory_space<vmem>>, vector<1x32xf32>
    %12 = vector.broadcast %11 : vector<1x32xf32> to vector<32x32xf32>
    %13 = arith.addf %10, %12 : vector<32x32xf32>
    %14 = math.tanh %13 : vector<32x32xf32>
    %15 = arith.truncf %14 : vector<32x32xf32> to vector<32x32xbf16>
    %c0_10 = arith.constant 0 : index
    %c0_11 = arith.constant 0 : index
    %16 = vector.load %arg6[%c0_10, %c0_11] : memref<32x10xbf16, #tpu.memory_space<vmem>>, vector<32x10xbf16>
    %cst_12 = arith.constant dense<0.000000e+00> : vector<32x10xf32>
    %17 = tpu.matmul %15, %16, %cst_12 {dimension_numbers = #tpu.dot_dimension_numbers<[1], [0], [0], [1], [0, 0, 1, 1], [], []>} : vector<32x32xbf16>, vector<32x10xbf16>, vector<32x10xf32> -> vector<32x10xf32>
    %c0_13 = arith.constant 0 : index
    %c0_14 = arith.constant 0 : index
    %18 = vector.load %arg7[%c0_13, %c0_14] : memref<1x10xf32, #tpu.memory_space<vmem>>, vector<1x10xf32>
    %19 = vector.broadcast %18 : vector<1x10xf32> to vector<32x10xf32>
    %20 = arith.addf %17, %19 : vector<32x10xf32>
    %21 = arith.truncf %20 : vector<32x10xf32> to vector<32x10xbf16>
    %c0_15 = arith.constant 0 : index
    %c0_16 = arith.constant 0 : index
    %22 = vector.load %arg8[%c0_15, %c0_16] : memref<10x52xbf16, #tpu.memory_space<vmem>>, vector<10x52xbf16>
    %cst_17 = arith.constant dense<0.000000e+00> : vector<32x52xf32>
    %23 = tpu.matmul %21, %22, %cst_17 {dimension_numbers = #tpu.dot_dimension_numbers<[1], [0], [0], [1], [0, 0, 1, 1], [], []>} : vector<32x10xbf16>, vector<10x52xbf16>, vector<32x52xf32> -> vector<32x52xf32>
    %c0_18 = arith.constant 0 : index
    %c0_19 = arith.constant 0 : index
    %24 = vector.load %arg9[%c0_18, %c0_19] : memref<1x52xf32, #tpu.memory_space<vmem>>, vector<1x52xf32>
    %25 = vector.broadcast %24 : vector<1x52xf32> to vector<32x52xf32>
    %26 = arith.addf %23, %25 : vector<32x52xf32>
    %27 = tpu.iota {dimensions = array<i32: 1>} : vector<32x52xi32>
    %c32_i32 = arith.constant 32 : i32
    %28 = vector.broadcast %c32_i32 : i32 to vector<32x52xi32>
    %29 = arith.cmpi slt, %27, %28 : vector<32x52xi32>
    %30 = math.tanh %26 : vector<32x52xf32>
    %cst_20 = arith.constant 0.000000e+00 : f32
    %31 = vector.broadcast %cst_20 : f32 to vector<32x52xf32>
    %32 = arith.maximumf %26, %31 : vector<32x52xf32>
    %33 = arith.select %29, %30, %32 : vector<32x52xi1>, vector<32x52xf32>
    %34 = arith.truncf %33 : vector<32x52xf32> to vector<32x52xbf16>
    %c0_21 = arith.constant 0 : index
    %c0_22 = arith.constant 0 : index
    %35 = vector.load %arg10[%c0_21, %c0_22] : memref<52x54xbf16, #tpu.memory_space<vmem>>, vector<52x54xbf16>
    %cst_23 = arith.constant dense<0.000000e+00> : vector<32x54xf32>
    %36 = tpu.matmul %34, %35, %cst_23 {dimension_numbers = #tpu.dot_dimension_numbers<[1], [0], [0], [1], [0, 0, 1, 1], [], []>} : vector<32x52xbf16>, vector<52x54xbf16>, vector<32x54xf32> -> vector<32x54xf32>
    %c0_24 = arith.constant 0 : index
    %c0_25 = arith.constant 0 : index
    %37 = vector.load %arg11[%c0_24, %c0_25] : memref<1x54xf32, #tpu.memory_space<vmem>>, vector<1x54xf32>
    %38 = vector.broadcast %37 : vector<1x54xf32> to vector<32x54xf32>
    %39 = arith.addf %36, %38 : vector<32x54xf32>
    %40 = math.tanh %39 : vector<32x54xf32>
    %41 = arith.truncf %40 : vector<32x54xf32> to vector<32x54xbf16>
    %c0_26 = arith.constant 0 : index
    %c0_27 = arith.constant 0 : index
    %42 = vector.load %arg12[%c0_26, %c0_27] : memref<54x99xbf16, #tpu.memory_space<vmem>>, vector<54x99xbf16>
    %cst_28 = arith.constant dense<0.000000e+00> : vector<32x99xf32>
    %43 = tpu.matmul %41, %42, %cst_28 {dimension_numbers = #tpu.dot_dimension_numbers<[1], [0], [0], [1], [0, 0, 1, 1], [], []>} : vector<32x54xbf16>, vector<54x99xbf16>, vector<32x99xf32> -> vector<32x99xf32>
    %c0_29 = arith.constant 0 : index
    %c0_30 = arith.constant 0 : index
    %44 = vector.load %arg13[%c0_29, %c0_30] : memref<1x99xf32, #tpu.memory_space<vmem>>, vector<1x99xf32>
    %45 = vector.broadcast %44 : vector<1x99xf32> to vector<32x99xf32>
    %46 = arith.addf %43, %45 : vector<32x99xf32>
    %cst_31 = arith.constant 0.000000e+00 : f32
    %47 = vector.broadcast %cst_31 : f32 to vector<32x99xf32>
    %48 = arith.maximumf %46, %47 : vector<32x99xf32>
    %c0_32 = arith.constant 0 : index
    %c0_33 = arith.constant 0 : index
    %49 = vector.load %arg14[%c0_32, %c0_33] : memref<52x1xbf16, #tpu.memory_space<vmem>>, vector<52x1xbf16>
    %cst_34 = arith.constant dense<0.000000e+00> : vector<32x1xf32>
    %50 = tpu.matmul %34, %49, %cst_34 {dimension_numbers = #tpu.dot_dimension_numbers<[1], [0], [0], [1], [0, 0, 1, 1], [], []>} : vector<32x52xbf16>, vector<52x1xbf16>, vector<32x1xf32> -> vector<32x1xf32>
    %c0_35 = arith.constant 0 : index
    %c0_36 = arith.constant 0 : index
    %51 = vector.load %arg15[%c0_35, %c0_36] : memref<1x1xf32, #tpu.memory_space<vmem>>, vector<1x1xf32>
    %52 = vector.broadcast %51 : vector<1x1xf32> to vector<32x1xf32>
    %53 = arith.addf %50, %52 : vector<32x1xf32>
    %54 = arith.negf %53 : vector<32x1xf32>
    %55 = math.exp %54 : vector<32x1xf32>
    %cst_37 = arith.constant 1.000000e+00 : f32
    %56 = vector.broadcast %cst_37 : f32 to vector<32x1xf32>
    %57 = arith.addf %56, %55 : vector<32x1xf32>
    %58 = arith.divf %56, %57 : vector<32x1xf32>
    %c0_38 = arith.constant 0 : index
    %c0_39 = arith.constant 0 : index
    %59 = vector.load %arg16[%c0_38, %c0_39] : memref<32x10xf32, #tpu.memory_space<vmem>>, vector<32x10xf32>
    tpu.vector_store %arg16[%c0_38, %c0_39], %20 {strides = array<i32>} : memref<32x10xf32, #tpu.memory_space<vmem>>, vector<32x10xf32>,
    %c0_40 = arith.constant 0 : index
    %c0_41 = arith.constant 0 : index
    %60 = vector.load %arg17[%c0_40, %c0_41] : memref<32x99xf32, #tpu.memory_space<vmem>>, vector<32x99xf32>
    tpu.vector_store %arg17[%c0_40, %c0_41], %48 {strides = array<i32>} : memref<32x99xf32, #tpu.memory_space<vmem>>, vector<32x99xf32>,
    %c0_42 = arith.constant 0 : index
    %c0_43 = arith.constant 0 : index
    %61 = vector.load %arg18[%c0_42, %c0_43] : memref<32x1xf32, #tpu.memory_space<vmem>>, vector<32x1xf32>
    tpu.vector_store %arg18[%c0_42, %c0_43], %58 {strides = array<i32>} : memref<32x1xf32, #tpu.memory_space<vmem>>, vector<32x1xf32>,
    return
  }
  func.func @transform_0(%arg0: i32) -> (i32, i32) {
    %c0_i32 = arith.constant 0 : i32
    %c0_i32_0 = arith.constant 0 : i32
    return %arg0, %c0_i32 : i32, i32
  }
  func.func @transform_1(%arg0: i32) -> (i32, i32) {
    %c0_i32 = arith.constant 0 : i32
    %c0_i32_0 = arith.constant 0 : i32
    %c0_i32_1 = arith.constant 0 : i32
    return %c0_i32, %c0_i32_0 : i32, i32
  }
  func.func @transform_2(%arg0: i32) -> (i32, i32) {
    %c0_i32 = arith.constant 0 : i32
    %c0_i32_0 = arith.constant 0 : i32
    %c0_i32_1 = arith.constant 0 : i32
    return %c0_i32, %c0_i32_0 : i32, i32
  }
  func.func @transform_3(%arg0: i32) -> (i32, i32) {
    %c0_i32 = arith.constant 0 : i32
    %c0_i32_0 = arith.constant 0 : i32
    %c0_i32_1 = arith.constant 0 : i32
    return %c0_i32, %c0_i32_0 : i32, i32
  }
  func.func @transform_4(%arg0: i32) -> (i32, i32) {
    %c0_i32 = arith.constant 0 : i32
    %c0_i32_0 = arith.constant 0 : i32
    %c0_i32_1 = arith.constant 0 : i32
    return %c0_i32, %c0_i32_0 : i32, i32
  }
  func.func @transform_5(%arg0: i32) -> (i32, i32) {
    %c0_i32 = arith.constant 0 : i32
    %c0_i32_0 = arith.constant 0 : i32
    %c0_i32_1 = arith.constant 0 : i32
    return %c0_i32, %c0_i32_0 : i32, i32
  }
  func.func @transform_6(%arg0: i32) -> (i32, i32) {
    %c0_i32 = arith.constant 0 : i32
    %c0_i32_0 = arith.constant 0 : i32
    %c0_i32_1 = arith.constant 0 : i32
    return %c0_i32, %c0_i32_0 : i32, i32
  }
  func.func @transform_7(%arg0: i32) -> (i32, i32) {
    %c0_i32 = arith.constant 0 : i32
    %c0_i32_0 = arith.constant 0 : i32
    %c0_i32_1 = arith.constant 0 : i32
    return %c0_i32, %c0_i32_0 : i32, i32
  }
  func.func @transform_8(%arg0: i32) -> (i32, i32) {
    %c0_i32 = arith.constant 0 : i32
    %c0_i32_0 = arith.constant 0 : i32
    %c0_i32_1 = arith.constant 0 : i32
    return %c0_i32, %c0_i32_0 : i32, i32
  }
  func.func @transform_9(%arg0: i32) -> (i32, i32) {
    %c0_i32 = arith.constant 0 : i32
    %c0_i32_0 = arith.constant 0 : i32
    %c0_i32_1 = arith.constant 0 : i32
    return %c0_i32, %c0_i32_0 : i32, i32
  }
  func.func @transform_10(%arg0: i32) -> (i32, i32) {
    %c0_i32 = arith.constant 0 : i32
    %c0_i32_0 = arith.constant 0 : i32
    %c0_i32_1 = arith.constant 0 : i32
    return %c0_i32, %c0_i32_0 : i32, i32
  }
  func.func @transform_11(%arg0: i32) -> (i32, i32) {
    %c0_i32 = arith.constant 0 : i32
    %c0_i32_0 = arith.constant 0 : i32
    %c0_i32_1 = arith.constant 0 : i32
    return %c0_i32, %c0_i32_0 : i32, i32
  }
  func.func @transform_12(%arg0: i32) -> (i32, i32) {
    %c0_i32 = arith.constant 0 : i32
    %c0_i32_0 = arith.constant 0 : i32
    %c0_i32_1 = arith.constant 0 : i32
    return %c0_i32, %c0_i32_0 : i32, i32
  }
  func.func @transform_13(%arg0: i32) -> (i32, i32) {
    %c0_i32 = arith.constant 0 : i32
    %c0_i32_0 = arith.constant 0 : i32
    %c0_i32_1 = arith.constant 0 : i32
    return %c0_i32, %c0_i32_0 : i32, i32
  }
  func.func @transform_14(%arg0: i32) -> (i32, i32) {
    %c0_i32 = arith.constant 0 : i32
    %c0_i32_0 = arith.constant 0 : i32
    %c0_i32_1 = arith.constant 0 : i32
    return %c0_i32, %c0_i32_0 : i32, i32
  }
  func.func @transform_15(%arg0: i32) -> (i32, i32) {
    %c0_i32 = arith.constant 0 : i32
    %c0_i32_0 = arith.constant 0 : i32
    return %arg0, %c0_i32 : i32, i32
  }
  func.func @transform_16(%arg0: i32) -> (i32, i32) {
    %c0_i32 = arith.constant 0 : i32
    %c0_i32_0 = arith.constant 0 : i32
    return %arg0, %c0_i32 : i32, i32
  }
  func.func @transform_17(%arg0: i32) -> (i32, i32) {
    %c0_i32 = arith.constant 0 : i32
    %c0_i32_0 = arith.constant 0 : i32
    return %arg0, %c0_i32 : i32, i32
  }
}

</mosaic_0001>

<bundles_post_ra>
// kernel: my_autoencoder_forward.1
= control target key start
LH: loop header
LB: loop body
LE: loop exit
PB: predicated region body
PF: predicated region fallthrough
CT: control target
= control target key end

     0   :  { %s1909_s0 = inlined_call_operand.vmem [shape: f32[64,99], index: 0, kind: input, shape index: {}]   ;;  %s1910_s1 = inlined_call_operand.vmem [shape: bf16[99,54], index: 1, kind: input, shape index: {}]   ;;  %s1911_s2 = inlined_call_operand.vmem [shape: f32[1,54], index: 2, kind: input, shape index: {}]   ;;  %s1912_s3 = inlined_call_operand.vmem [shape: bf16[54,32], index: 3, kind: input, shape index: {}]   ;;  %s1913_s4 = inlined_call_operand.vmem [shape: f32[1,32], index: 4, kind: input, shape index: {}]   ;;  %s1914_s5 = inlined_call_operand.vmem [shape: bf16[32,10], index: 5, kind: input, shape index: {}]   ;;  %s1915_s6 = inlined_call_operand.vmem [shape: f32[1,10], index: 6, kind: input, shape index: {}]   ;;  %s1916_s7 = inlined_call_operand.vmem [shape: bf16[10,52], index: 7, kind: input, shape index: {}]   ;;  %s1917_s8 = inlined_call_operand.vmem [shape: f32[1,52], index: 8, kind: input, shape index: {}]   ;;  %s1918_s9 = inlined_call_operand.vmem [shape: bf16[52,54], index: 9, kind: input, shape index: {}]   ;;  %s1919_s10 = inlined_call_operand.vmem [shape: f32[1,54], index: 10, kind: input, shape index: {}]   ;;  %s1920_s11 = inlined_call_operand.vmem [shape: bf16[54,99], index: 11, kind: input, shape index: {}]   ;;  %s1921_s12 = inlined_call_operand.vmem [shape: f32[1,99], index: 12, kind: input, shape index: {}]   ;;  %s1922_s13 = inlined_call_operand.vmem [shape: bf16[52,1], index: 13, kind: input, shape index: {}]   ;;  %s1923_s14 = inlined_call_operand.<no memory space> [shape: f32[1,1], index: 14, kind: input, shape index: {}]   ;;  %s1924_s15 = inlined_call_operand.vmem [shape: f32[64,10], index: 15, kind: output, shape index: {0}]   ;;  %s1925_s16 = inlined_call_operand.hbm [shape: f32[64,99], index: 16, kind: output, shape index: {1}]   ;;  %s1926_s17 = inlined_call_operand.vmem [shape: f32[64,1], index: 17, kind: output, shape index: {2}]  }
   0x1   :  { %1933 = sst [smem:[#allocation11_spill]] %s1909_s0  ;;  %v23_v0 = vstv %s1923_s14 }
   0x2   :  { %1934 = sst [smem:[#allocation12_spill]] %s1910_s1  ;;  %24 = vst [vmem:[#allocation2] sm:$0x1] %v23_v0 }
   0x3   :  { %1935 = sst [smem:[#allocation13_spill]] %s1911_s2 }
   0x4   :  { %1936 = sst [smem:[#allocation14_spill]] %s1912_s3 }
   0x5   :  { %25 = vsyncpa [#allocation4], 0 }
   0x6   :  { %27 = vsyncpa [#allocation4 + $0x1], 0  ;;  %s1676_s26 = smov 0   ;;  %s1678_s27 = smov 0  }
   0x7   :  { %s1680_s28 = smov 0   ;;  %s1682_s29 = smov 0  }
   0x8 LB: > { %1937 = sst [smem:[#allocation6_spill]] %s1566_s26  ;;  %s1697_s14 = sadd.s32 4294967295, %s1578_s29   ;;  %s1578_s29 = sphi %s1682_s29, %s1950_s29   ;;  %s1574_s28 = sphi %s1680_s28, %s1955_s28   ;;  %s1570_s27 = sphi %s1678_s27, %s1954_s27   ;;  %s1566_s26 = sphi %s1676_s26, %s1953_s26  }
   0x9   : > { %1938 = sst [smem:[#allocation7_spill]] %s1574_s28  ;;  %s1275_s0 = sadd.s32 4294967294, %s1578_s29  }
   0xa   : > { %s1701_s30 = sadd.s32 1, %s1578_s29   ;;  %s386_s18 = sadd.s32 1, %s1574_s28 }
   0xb   : > { %1939 = sst [smem:[#allocation8_spill]] %s1701_s30  ;;  %s383_s19 = ssub.s32 %s1578_s29, %s1701_s30 }
   0xc   : > { %p396_p0 = scmp.ne.s32.totalorder %s1574_s28, %s1570_s27  ;;  %p384_p1 = scmp.eq.s32.totalorder %s383_s19, 0 }
   0xd   : > { %p397_p2 = scmp.eq.s32.totalorder %s1697_s14, 1  ;;  %p402_p3 = scmp.ne.s32.totalorder %s1570_s27, %s1566_s26 }
   0xe   : > { %p403_p4 = scmp.eq.s32.totalorder %s1275_s0, 1  ;;  %p1278_p7 = scmp.ge.s32.totalorder %s1578_s29, 1 }
   0xf   : > { %s1712_s1 = scalar_select %p384_p1, %s1574_s28, %s386_s18  }
  0x10   : > { %p1714_p5 = por %p397_p2, %p396_p0  ;;  %p1718_p6 = por %p403_p4, %p402_p3 }
  0x11   : > { %1940 = sst [smem:[#allocation9_spill]] %s1712_s1  ;;  %p498_p8 = scmp.lt.s32.totalorder %s1578_s29, 3 }
  0x12   : > { %s1942_s21 = scalar_select %p1718_p6, 1, 0 }
  0x13   : > { %p499_p9 = pnand %p1278_p7, %p498_p8 }
  0x14   : > { %1943 = sst [smem:[#allocation10_spill]] %s1942_s21  ;;  %s1280_s18 = sshll.u32 (!%p499_p9), %s1697_s14, 2 }
  0x15   : > { %502 = sbr.rel (%p499_p9) target bundleno = 962 (0x3c2), region = 80  ;;  %s1944_s24 = sld [smem:[#allocation12_spill]] (!%p499_p9) }
  0x16   : > { %p561_p10 = scmp.lt.s32.totalorder (!%p499_p9), %s1280_s18, 7  ;;  %s1945_s3 = sld [smem:[#allocation14_spill]] (!%p499_p9) }
  0x17   : > { %s1946_s23 = sld [smem:[#allocation11_spill]] (!%p499_p9) }
  0x18   : > { %s1947_s2 = sld [smem:[#allocation13_spill]] (!%p499_p9) }
  0x1a   : > { %vm649_vm0 = vcmask 1040384   ;;  %vm650_vm1 = vcmask 1041408   ;;  %v1580_v3 = vmov 65535   ;;  %s1957_s18 = smov (!%p561_p10, %s1280_s18), 7  ;;  %vm720_vm2 = vcmask 1042432   ;;  %v1403_v42 = vld [vmem:[%s1914_s5 + $0x8] sm:$0xff] }
  0x1b   : > { %v598_v1 = vld [vmem:[%s1944_s24 + $0x30] sm:$0x3]  ;;  %v651_v4 = vsel %vm649_vm0, 4294967295, %v1580_v3  ;;  %v1398_v8 = vld [vmem:[%s1944_s24 + $0x28] sm:$0xff]  ;;  %v1397_v9 = vld [vmem:[%s1944_s24 + $0x20] sm:$0xff]  ;;  %s1744_s19 = sshll.u32 %s1957_s18, 3  ;;  %782 = vmatpush.bf16.msra.mxu2 %v1403_v42 }
  0x1c   : > { %v628_v2 = vunpack.c.l.b16 %v598_v1  ;;  %v652_v5 = vsel %vm650_vm1, %v651_v4, 0  ;;  %v1396_v10 = vld [vmem:[%s1944_s24 + $0x18] sm:$0xff]  ;;  %v1395_v12 = vld [vmem:[%s1944_s24 + $0x10] sm:$0xff]  ;;  %v1394_v15 = vld [vmem:[%s1944_s24 + $0x8] sm:$0xff]  ;;  %vm642_vm3 = vcmask 809984   ;;  %vm713_vm4 = vcmask 441344   ;;  %s570_s26 = scalar_lea.vmem %s1924_s15, %s1744_s19  ;;  %s1859_s1 = scalar_lea.vmem %s1926_s17, %s1744_s19 }
  0x1d   : > { %v687_v11 = vld [vmem:[%s1945_s3 + $0x18] sm:$0x7]  ;;  %s564_s21 = scalar_lea.vmem %s1946_s23, %s1744_s19  ;;  %v1401_v17 = vld [vmem:[%s1945_s3 + $0x10] sm:$0xff]  ;;  %v1393_v18 = vld [vmem:[%s1944_s24] sm:$0xff]  ;;  %vm769_vm5 = vcmask 261120   ;;  %vm815_vm6 = vcmask 1044480  }
  0x1e   : > { %v635_v6 = vpack.c.b16 %v628_v2, %v628_v2  ;;  %v705_v13 = vunpack.c.l.b16 %v687_v11  ;;  %v580_v19 = vld [vmem:[%s564_s21] sm:$0xff]  ;;  %v581_v20 = vld [vmem:[%s564_s21 + $0x8] sm:$0xff]  ;;  %v582_v22 = vld [vmem:[%s564_s21 + $0x10] sm:$0xff]  ;;  %vm808_vm7 = vcmask 80896   ;;  %vm887_vm9 = vcmask 424960   ;;  %s550_s19 = sand.u32 1, %s1570_s27  }
  0x1f   : > { %v584_v21 = vpack.c.bf16 %v581_v20, %v580_v19  ;;  %v583_v23 = vld [vmem:[%s564_s21 + $0x18] sm:$0xff]  ;;  %v1400_v25 = vld [vmem:[%s1945_s3 + $0x8] sm:$0xff]  ;;  %v1399_v26 = vld [vmem:[%s1945_s3] sm:$0xff]  ;;  %vm1124_vm13 = vcmask 7168   ;;  %s1279_s30 = sshll.u32 %s550_s19, 5  ;;  %s1414_s21 = sshll.u32 %s1697_s14, 5 }
  0x20   : > { %v654_v7 = vand.u32 %v652_v5, %v635_v6  ;;  %v709_v14 = vpack.c.b16 %v705_v13, %v705_v13  ;;  %v585_v24 = vpack.c.bf16 %v583_v23, %v582_v22  ;;  %v1461_v28 = vld [vmem:[%s1947_s2] ss:$0 sm:$0xff]  ;;  %v1404_v60 = vld [vmem:[%s1916_s7] sm:$0x10]  ;;  %v861_v0 = vld [vmem:[%s1918_s9 + $0x18] sm:$0x3]  ;;  %s1155_s18 = scalar_lea.hbm %s1925_s16, %s1414_s21 }
  0x21   : > { %v1402_v43 = vld [vmem:[%s1914_s5] sm:$0xff]  ;;  %v879_v1 = vunpack.c.l.b16 %v861_v0  ;;  %v1407_v6 = vld [vmem:[%s1918_s9 + $0x10] sm:$0xff]  ;;  %v1406_v20 = vld [vmem:[%s1918_s9 + $0x8] sm:$0xff]  ;;  %s552_s23 = scalar_lea.vmem [#allocation3], %s1279_s30  ;;  %s1536_s21 = scalar_lea.hbm %s1925_s16, 64 }
  0x22   : > { %657 = vmatpush.bf16.msra.mxu0 %v654_v7  ;;  %v722_v16 = vsel %vm720_vm2, %v709_v14, 0  ;;  %783 = vmatpush.bf16.msra.mxu2 %v1402_v43  ;;  %v1462_v45 = vld [vmem:[%s1913_s4] ss:$0 sm:$0xff]  ;;  %v1413_v19 = vld [vmem:[%s1922_s13 + $0x10] sm:$0xff]  ;;  %s1156_s22 = sshll.u32 %s552_s23, 4  ;;  %s1157_s22 = int_to_ptr.vmem [resolvable:$true] %s1156_s22 }
  0x23   : > { %1415 = vmatpush.bf16.msra.mxu1 %v722_v16  ;;  %v1338_v59 = vld [vmem:[%s1916_s7] sm:$0xf]  ;;  %v883_v3 = vpack.c.b16 %v879_v1, %v879_v1 }
  0x24   : > { %v1339_v61 = vor.u32 %v1404_v60, %v1338_v59  ;;  %v1463_v63 = vld [vmem:[%s1915_s6] ss:$0 sm:$0xff] }
  0x25   : > { %v895_v5 = vsel %vm650_vm1, %v883_v3, 0  ;;  %v1405_v22 = vld [vmem:[%s1918_s9] sm:$0xff] }
  0x26   : > { %658 = vmatpush.bf16.msra.mxu0 %v1398_v8  ;;  %v817_v62 = vsel %vm815_vm6, %v1339_v61, 0  ;;  %v1411_v23 = vld [vmem:[%s1922_s13] sm:$0xff] }
  0x27   : > { %1416 = vmatpush.bf16.msra.mxu1 %v1401_v17  ;;  %826 = vmatpush.bf16.msra.mxu3 %v817_v62  ;;  %v1466_v61 = vld [vmem:[%s1919_s10] ss:$0 sm:$0xff] }
  0x2a   : > { %659 = vmatpush.bf16.msra.mxu0 %v1397_v9 }
  0x2b   : > { %1417 = vmatpush.bf16.msra.mxu1 %v1400_v25  ;;  %901 = vmatpush.bf16.msrb.mxu3 %v895_v5 }
  0x2e   : > { %660 = vmatpush.bf16.msra.mxu0 %v1396_v10 }
  0x2f   : > { %1418 = vmatpush.bf16.msra.mxu1 %v1399_v26  ;;  %902 = vmatpush.bf16.msrb.mxu3 %v1407_v6 }
  0x32   : > { %661 = vmatpush.bf16.msra.mxu0 %v1395_v12 }
  0x33   : > { %903 = vmatpush.bf16.msrb.mxu3 %v1406_v20 }
  0x36   : > { %662 = vmatpush.bf16.msra.mxu0 %v1394_v15  ;;  %v992_v15 = vld [vmem:[%s1922_s13 + $0x18] sm:$0x3] }
  0x37   : > { %904 = vmatpush.bf16.msrb.mxu3 %v1405_v22 }
  0x3a   : > { %663 = vmatpush.bf16.msra.mxu0 %v1393_v18 }
  0x3d   : > { %1310 = vmatmul.msk.bf16.vlgmr.msra.gmra.mxu0 %vm642_vm3, %v584_v21  ;;  %v1412_v21 = vld [vmem:[%s1922_s13 + $0x8] sm:$0xff] }
  0x3e   : > { %728 = vmatpush.bf16.msrb.mxu0 %v722_v16  ;;  %v1010_v16 = vunpack.c.l.b16 %v992_v15 }
  0x42   : > { %729 = vmatpush.bf16.msrb.mxu0 %v1401_v17  ;;  %v1014_v17 = vpack.c.b16 %v1010_v16, %v1010_v16 }
  0x44   : > { %v1019_v18 = vsel %vm650_vm1, %v1014_v17, 0 }
  0x45   : > { %1025 = vmatpush.bf16.msrb.mxu1 %v1019_v18 }
  0x46   : > { %730 = vmatpush.bf16.msrb.mxu0 %v1400_v25  ;;  %v1464_v25 = vld [vmem:[%s1917_s8] ss:$0 sm:$0xff] }
  0x49   : > { %1026 = vmatpush.bf16.msrb.mxu1 %v1413_v19 }
  0x4a   : > { %731 = vmatpush.bf16.msrb.mxu0 %v1399_v26 }
  0x4d   : > { %1311 = vmatmul.msk.bf16.gmra.mxu0 %vm642_vm3, %v585_v24  ;;  %1027 = vmatpush.bf16.msrb.mxu1 %v1412_v21 }
  0x51   : > { %1028 = vmatpush.bf16.msrb.mxu1 %v1411_v23 }
  0xba   : > { %v665_v27 = vpop.f32.mrf.mxu0 }
  0xbb   : > { %v666_v29 = vadd.f32 %v1461_v28, %v665_v27  ;;  %v928_v27 = vld [vmem:[%s1920_s11 + $0x18] sm:$0x7] }
  0xbd   : > { %1468 = vtanh.f32 %v666_v29  ;;  %v838_v29 = vlaneseq }
  0xc2   : > { %v667_v30 = vpop.f32.mrf.mxu0 }
  0xc3   : > { %v668_v31 = vadd.f32 %v1461_v28, %v667_v30  ;;  %v1469_v32 = vpop.eup %1468 }
  0xc5   : > { %1470 = vtanh.f32 %v668_v31 }
  0xca   : > { %v670_v33 = vpop.f32.mrf.mxu0 }
  0xcb   : > { %v1471_v34 = vpop.eup %1470  ;;  %v671_v36 = vadd.f32 %v1461_v28, %v670_v33 }
  0xcc   : > { %v679_v35 = vpack.c.bf16 %v1471_v34, %v1469_v32  ;;  %v839_v34 = vand.u32 127, %v838_v29 }
  0xcd   : > { %1472 = vtanh.f32 %v671_v36 }
  0xce   : > { %1324 = vmatmul.msk.bf16.vlgmr.msrb.gmra.mxu0 %vm713_vm4, %v679_v35  ;;  %vm840_vm8 = vcmp.lt.s32.totalorder %v839_v34, 32 }
  0xd2   : > { %v672_v37 = vpop.f32.mrf.mxu0 }
  0xd3   : > { %v673_v38 = vadd.f32 %v1461_v28, %v672_v37  ;;  %v1473_v39 = vpop.eup %1472  ;;  %v946_v28 = vunpack.c.l.b16 %v928_v27 }
  0xd5   : > { %1474 = vtanh.f32 %v673_v38  ;;  %v950_v31 = vpack.c.b16 %v946_v28, %v946_v28 }
  0xd7   : > { %v961_v33 = vsel %vm720_vm2, %v950_v31, 0 }
  0xd8   : > { %967 = vmatpush.bf16.msrb.mxu2 %v961_v33 }
  0xdb   : > { %v1475_v40 = vpop.eup %1474 }
  0xdc   : > { %v680_v41 = vpack.c.bf16 %v1475_v40, %v1473_v39 }
  0xde   : > { %1325 = vmatmul.msk.bf16.vlgmr.msra.gmra.mxu1 %vm713_vm4, %v680_v41 }
 0x14b   : > { %v733_v44 = vpop.f32.mrf.mxu0 }
 0x14c   : > { %v734_v46 = vadd.f32 %v1462_v45, %v733_v44 }
 0x14e   : > { %1476 = vtanh.f32 %v734_v46 }
 0x153   : > { %v735_v47 = vpop.f32.mrf.mxu0 }
 0x154   : > { %v736_v48 = vadd.f32 %v1462_v45, %v735_v47  ;;  %v1477_v49 = vpop.eup %1476 }
 0x156   : > { %1478 = vtanh.f32 %v736_v48 }
 0x15b   : > { %v738_v50 = vpop.f32.mrf.mxu1 }
 0x15c   : > { %v1479_v51 = vpop.eup %1478  ;;  %v739_v53 = vadd.f32 %v1462_v45, %v738_v50 }
 0x15d   : > { %v747_v52 = vpack.c.bf16 %v1479_v51, %v1477_v49 }
 0x15e   : > { %1480 = vtanh.f32 %v739_v53  ;;  %v1410_v53 = vld [vmem:[%s1920_s11 + $0x10] sm:$0xff] }
 0x15f   : > { %1334 = vmatmul.msk.bf16.vlgmr.msra.gmra.mxu2 %vm769_vm5, %v747_v52 }
 0x160   : > { %968 = vmatpush.bf16.msrb.mxu2 %v1410_v53 }
 0x163   : > { %v740_v54 = vpop.f32.mrf.mxu1 }
 0x164   : > { %v741_v55 = vadd.f32 %v1462_v45, %v740_v54  ;;  %v1481_v56 = vpop.eup %1480  ;;  %v1409_v54 = vld [vmem:[%s1920_s11 + $0x8] sm:$0xff] }
 0x165   : > { %969 = vmatpush.bf16.msrb.mxu2 %v1409_v54 }
 0x166   : > { %1482 = vtanh.f32 %v741_v55  ;;  %v1408_v55 = vld [vmem:[%s1920_s11] sm:$0xff] }
 0x169   : > { %970 = vmatpush.bf16.msrb.mxu2 %v1408_v55 }
 0x16c   : > { %v1483_v57 = vpop.eup %1482 }
 0x16d   : > { %v748_v58 = vpack.c.bf16 %v1483_v57, %v1481_v56  ;;  %v1465_v56 = vld [vmem:[#allocation2] ss:$0 sm:$0xff] }
 0x16f   : > { %1335 = vmatmul.msk.bf16.gmra.mxu2 %vm769_vm5, %v748_v58 }
 0x1e2   : > { %v785_v2 = vpop.f32.mrf.mxu2 }
 0x1e3   : > { %v786_v4 = vadd.f32 %v1463_v63, %v785_v2 }
 0x1e5   : > { %1116 = vst.msk [vmem:[%s570_s26] sm:$0xff] %vm808_vm7, %v786_v4 }
 0x1ea   : > { %v787_v7 = vpop.f32.mrf.mxu2 }
 0x1eb   : > { %v788_v8 = vadd.f32 %v1463_v63, %v787_v7 }
 0x1ed   : > { %v795_v9 = vpack.c.bf16 %v788_v8, %v786_v4  ;;  %1117 = vst.msk [vmem:[%s570_s26 + $0x8] sm:$0xff] %vm808_vm7, %v788_v8 }
 0x1ef   : > { %1340 = vmatmul.msk.bf16.vlgmr.msra.gmra.mxu3 %vm808_vm7, %v795_v9 }
 0x1f2   : > { %v790_v10 = vpop.f32.mrf.mxu2 }
 0x1f3   : > { %v791_v11 = vadd.f32 %v1463_v63, %v790_v10 }
 0x1f5   : > { %1118 = vst.msk [vmem:[%s570_s26 + $0x10] sm:$0xff] %vm808_vm7, %v791_v11 }
 0x1fa   : > { %v792_v12 = vpop.f32.mrf.mxu2 }
 0x1fb   : > { %v793_v13 = vadd.f32 %v1463_v63, %v792_v12 }
 0x1fd   : > { %v796_v14 = vpack.c.bf16 %v793_v13, %v791_v11  ;;  %1119 = vst.msk [vmem:[%s570_s26 + $0x18] sm:$0xff] %vm808_vm7, %v793_v13  ;;  %s1135_s26 = scalar_lea.sflag [#allocation4], %s550_s19 }
 0x1ff   : > { %1341 = vmatmul.msk.bf16.gmra.mxu3 %vm808_vm7, %v796_v14 }
 0x272   : > { %v828_v24 = vpop.f32.mrf.mxu3 }
 0x273   : > { %v829_v26 = vadd.f32 %v1464_v25, %v828_v24 }
 0x275   : > { %1484 = vtanh.f32 %v829_v26  ;;  %v845_v36 = vmax.f32 %v829_v26, 0.0 }
 0x27a   : > { %v830_v30 = vpop.f32.mrf.mxu3 }
 0x27b   : > { %v831_v32 = vadd.f32 %v1464_v25, %v830_v30  ;;  %v1485_v35 = vpop.eup %1484 }
 0x27c   : > { %v849_v40 = vsel %vm840_vm8, %v1485_v35, %v845_v36 }
 0x27d   : > { %1486 = vtanh.f32 %v831_v32  ;;  %v846_v37 = vmax.f32 %v831_v32, 0.0 }
 0x282   : > { %v833_v38 = vpop.f32.mrf.mxu3 }
 0x283   : > { %v1487_v39 = vpop.eup %1486  ;;  %v834_v43 = vadd.f32 %v1464_v25, %v833_v38 }
 0x284   : > { %v850_v41 = vsel %vm840_vm8, %v1487_v39, %v846_v37 }
 0x285   : > { %v853_v42 = vpack.c.bf16 %v850_v41, %v849_v40  ;;  %1488 = vtanh.f32 %v834_v43  ;;  %v847_v47 = vmax.f32 %v834_v43, 0.0 }
 0x287   : > { %1354 = vmatmul.msk.bf16.vlgmr.msrb.gmra.mxu3 %vm887_vm9, %v853_v42  ;;  %1382 = vmatmul.msk.bf16.vlgmr.msrb.gmra.mxu1 %vm887_vm9, %v853_v42 }
 0x28a   : > { %v835_v44 = vpop.f32.mrf.mxu3 }
 0x28b   : > { %v836_v45 = vadd.f32 %v1464_v25, %v835_v44  ;;  %v1489_v46 = vpop.eup %1488 }
 0x28c   : > { %v851_v50 = vsel %vm840_vm8, %v1489_v46, %v847_v47 }
 0x28d   : > { %1490 = vtanh.f32 %v836_v45  ;;  %v848_v48 = vmax.f32 %v836_v45, 0.0 }
 0x293   : > { %v1491_v49 = vpop.eup %1490 }
 0x294   : > { %v852_v51 = vsel %vm840_vm8, %v1491_v49, %v848_v48 }
 0x295   : > { %v854_v52 = vpack.c.bf16 %v852_v51, %v851_v50 }
 0x297   : > { %1355 = vmatmul.msk.bf16.gmra.mxu3 %vm887_vm9, %v854_v52  ;;  %1383 = vmatmul.msk.bf16.gmra.mxu1 %vm887_vm9, %v854_v52 }
 0x304   : > { %v1030_v57 = vpop.f32.mrf.mxu1 }
 0x305   : > { %v1031_v58 = vadd.f32 %v1465_v56, %v1030_v57 }
 0x307   : > { %v1384_v59 = vmul.f32 -1.442695, %v1031_v58 }
 0x309   : > { %1492 = vpow2.f32 %v1384_v59 }
 0x30a   : > { %v906_v60 = vpop.f32.mrf.mxu3 }
 0x30b   : > { %v907_v3 = vadd.f32 %v1466_v61, %v906_v60 }
 0x30c   : > { %v1032_v62 = vpop.f32.mrf.mxu1 }
 0x30d   : > { %v1033_v63 = vadd.f32 %v1465_v56, %v1032_v62 }
 0x30f   : > { %v1493_v0 = vpop.eup %1492  ;;  %v1385_v1 = vmul.f32 -1.442695, %v1033_v63 }
 0x310   : > { %v1052_v2 = vadd.f32 1.0, %v1493_v0 }
 0x311   : > { %1494 = vpow2.f32 %v1385_v1 }
 0x312   : > { %1496 = vrcp.f32 %v1052_v2  ;;  %v908_v4 = vpop.f32.mrf.mxu3  ;;  %v1067_v17 = vand.u32 2147483648, %v1052_v2  ;;  %v1065_v21 = vand.u32 2147483647, %v1052_v2  ;;  %vm1061_vm11 = vweird.f32 %v1052_v2 }
 0x313   : > { %v909_v5 = vadd.f32 %v1466_v61, %v908_v4  ;;  %1498 = vtanh.f32 %v907_v3  ;;  %v1467_v4 = vld [vmem:[%s1921_s12] ss:$0 sm:$0xff] }
 0x314   : > { %v1035_v6 = vpop.f32.mrf.mxu1  ;;  %v1068_v27 = vor.u32 1.1754944e-38, %v1067_v17  ;;  %vm1066_vm14 = vcmp.eq.f32.partialorder %v1065_v21, 8.507059e+37 }
 0x315   : > { %1500 = vtanh.f32 %v909_v5  ;;  %v1036_v7 = vadd.f32 %v1465_v56, %v1035_v6 }
 0x317   : > { %v1495_v8 = vpop.eup %1494  ;;  %v1386_v9 = vmul.f32 -1.442695, %v1036_v7 }
 0x318   : > { %v1497_v10 = vpop.eup %1496  ;;  %v1053_v11 = vadd.f32 1.0, %v1495_v8 }
 0x319   : > { %v1057_v12 = vmul.f32 %v1497_v10, %v1052_v2  ;;  %1502 = vpow2.f32 %v1386_v9  ;;  %v1499_v13 = vpop.eup %1498  ;;  %vm1062_vm10 = vweird.f32 %v1497_v10 }
 0x31a   : > { %1504 = vrcp.f32 %v1053_v11  ;;  %v911_v14 = vpop.f32.mrf.mxu3  ;;  %vm1063_vm12 = vmor %vm1061_vm11, %vm1062_vm10  ;;  %v1082_v36 = vand.u32 2147483648, %v1053_v11  ;;  %v1080_v38 = vand.u32 2147483647, %v1053_v11  ;;  %vm1076_vm0 = vweird.f32 %v1053_v11 }
 0x31b   : > { %v1501_v15 = vpop.eup %1500  ;;  %v1058_v16 = vsub.f32 1.0, %v1057_v12  ;;  %v912_v29 = vadd.f32 %v1466_v61, %v911_v14 }
 0x31c   : > { %v1037_v18 = vpop.f32.mrf.mxu1  ;;  %v920_v19 = vpack.c.bf16 %v1501_v15, %v1499_v13  ;;  %v1083_v42 = vor.u32 1.1754944e-38, %v1082_v36  ;;  %vm1081_vm2 = vcmp.eq.f32.partialorder %v1080_v38, 8.507059e+37 }
 0x31d   : > { %v1059_v20 = vmul.f32 %v1497_v10, %v1058_v16  ;;  %v1038_v22 = vadd.f32 %v1465_v56, %v1037_v18 }
 0x31e   : > { %1368 = vmatmul.msk.bf16.vlgmr.msrb.gmra.mxu2 %vm713_vm4, %v920_v19 }
 0x31f   : > { %v1503_v23 = vpop.eup %1502  ;;  %v1060_v24 = vadd.f32 %v1497_v10, %v1059_v20  ;;  %v1387_v25 = vmul.f32 -1.442695, %v1038_v22 }
 0x320   : > { %v1505_v26 = vpop.eup %1504  ;;  %v1054_v28 = vadd.f32 1.0, %v1503_v23 }
 0x321   : > { %v1064_v30 = vsel %vm1063_vm12, %v1497_v10, %v1060_v24  ;;  %v1072_v31 = vmul.f32 %v1505_v26, %v1053_v11  ;;  %1506 = vpow2.f32 %v1387_v25  ;;  %vm1077_vm15 = vweird.f32 %v1505_v26 }
 0x322   : > { %v1069_v32 = vsel %vm1066_vm14, %v1068_v27, %v1064_v30  ;;  %1508 = vrcp.f32 %v1054_v28  ;;  %v913_v33 = vpop.f32.mrf.mxu3  ;;  %vm1078_vm1 = vmor %vm1076_vm0, %vm1077_vm15  ;;  %v1097_v50 = vand.u32 2147483648, %v1054_v28  ;;  %v1095_v53 = vand.u32 2147483647, %v1054_v28 }
 0x323   : > { %1125 = vst.msk [vmem:[%s1859_s1] sm:$0xff] %vm1124_vm13, %v1069_v32  ;;  %v1073_v34 = vsub.f32 1.0, %v1072_v31  ;;  %v914_v35 = vadd.f32 %v1466_v61, %v913_v33  ;;  %1510 = vtanh.f32 %v912_v29  ;;  %vm1091_vm6 = vweird.f32 %v1054_v28 }
 0x324   : > { %v1098_v56 = vor.u32 1.1754944e-38, %v1097_v50  ;;  %vm1096_vm8 = vcmp.eq.f32.partialorder %v1095_v53, 8.507059e+37 }
 0x325   : > { %v1074_v37 = vmul.f32 %v1505_v26, %v1073_v34  ;;  %1512 = vtanh.f32 %v914_v35 }
 0x327   : > { %v1507_v39 = vpop.eup %1506  ;;  %v1075_v40 = vadd.f32 %v1505_v26, %v1074_v37 }
 0x328   : > { %v1509_v41 = vpop.eup %1508  ;;  %v1055_v43 = vadd.f32 1.0, %v1507_v39 }
 0x329   : > { %v1079_v44 = vsel %vm1078_vm1, %v1505_v26, %v1075_v40  ;;  %v1087_v45 = vmul.f32 %v1509_v41, %v1054_v28  ;;  %v1511_v46 = vpop.eup %1510  ;;  %vm1092_vm5 = vweird.f32 %v1509_v41 }
 0x32a   : > { %v1084_v47 = vsel %vm1081_vm2, %v1083_v42, %v1079_v44  ;;  %1514 = vrcp.f32 %v1055_v43  ;;  %vm1093_vm7 = vmor %vm1091_vm6, %vm1092_vm5  ;;  %v1112_v61 = vand.u32 2147483648, %v1055_v43  ;;  %v1110_v63 = vand.u32 2147483647, %v1055_v43 }
 0x32b   : > { %v1513_v48 = vpop.eup %1512  ;;  %1126 = vst.msk [vmem:[%s1859_s1 + $0x8] sm:$0xff] %vm1124_vm13, %v1084_v47  ;;  %v1088_v49 = vsub.f32 1.0, %v1087_v45 }
 0x32c   : > { %v921_v51 = vpack.c.bf16 %v1513_v48, %v1511_v46  ;;  %v1113_v1 = vor.u32 1.1754944e-38, %v1112_v61  ;;  %vm1111_vm11 = vcmp.eq.f32.partialorder %v1110_v63, 8.507059e+37 }
 0x32d   : > { %v1089_v52 = vmul.f32 %v1509_v41, %v1088_v49 }
 0x32e   : > { %1369 = vmatmul.msk.bf16.gmra.mxu2 %vm713_vm4, %v921_v51  ;;  %vm1106_vm4 = vweird.f32 %v1055_v43 }
 0x32f   : > { %v1090_v54 = vadd.f32 %v1509_v41, %v1089_v52 }
 0x330   : > { %v1515_v55 = vpop.eup %1514 }
 0x331   : > { %v1094_v57 = vsel %vm1093_vm7, %v1509_v41, %v1090_v54  ;;  %v1102_v58 = vmul.f32 %v1515_v55, %v1055_v43  ;;  %vm1107_vm9 = vweird.f32 %v1515_v55 }
 0x332   : > { %v1099_v59 = vsel %vm1096_vm8, %v1098_v56, %v1094_v57  ;;  %vm1108_vm10 = vmor %vm1106_vm4, %vm1107_vm9 }
 0x333   : > { %1127 = vst.msk [vmem:[%s1859_s1 + $0x10] sm:$0xff] %vm1124_vm13, %v1099_v59  ;;  %v1103_v60 = vsub.f32 1.0, %v1102_v58 }
 0x335   : > { %v1104_v62 = vmul.f32 %v1515_v55, %v1103_v60 }
 0x337   : > { %v1105_v0 = vadd.f32 %v1515_v55, %v1104_v62 }
 0x339   : > { %v1109_v2 = vsel %vm1108_vm10, %v1515_v55, %v1105_v0 }
 0x33a   : > { %v1114_v3 = vsel %vm1111_vm11, %v1113_v1, %v1109_v2 }
 0x33b   : > { %1128 = vst.msk [vmem:[%s1859_s1 + $0x18] sm:$0xff] %vm1124_vm13, %v1114_v3  ;;  %s1158_s1 = sshll.u32 %s1155_s18, 4  ;;  %s1159_s1 = int_to_ptr.hbm [resolvable:$true] %s1158_s1 }
 0x33c   : > { %s1530_s28 = sshra.s32 %s1159_s1, 4  ;;  %s1531_s28 = int_to_ptr.hbm [resolvable:$true] %s1530_s28 }
 0x33d   : > { %s1532_s14 = scalar_lea.hbm %s1531_s28, 32  ;;  %p1537_p0 = scmp.lt.s32.totalorder %s1531_s28, %s1925_s16 }
 0x33e   : > { %p1533_p11 = scmp.ne.s32.totalorder %s1531_s28, %s1532_s14  ;;  %p1538_p1 = scmp.lt.s32.totalorder %s1536_s21, %s1532_s14 }
 0x340   : > { %p1534_p12 = pnand %p1533_p11, %p1714_p5  ;;  %p1539_p2 = por %p1538_p1, %p1537_p0 }
 0x342   : > { %p1535_p13 = pneg %p1534_p12 }
 0x344   : > { %p1540_p3 = pnand %p1539_p2, %p1535_p13 }
 0x3a1   : > { %v972_v5 = vpop.f32.mrf.mxu2 }
 0x3a2   : > { %v973_v6 = vadd.f32 %v1467_v4, %v972_v5 }
 0x3a4   : > { %v982_v7 = vmax.f32 %v973_v6, 0.0 }
 0x3a6   : > { %1120 = vst.msk [vmem:[%s552_s23] sm:$0xff] %vm642_vm3, %v982_v7 }
 0x3a9   : > { %v974_v8 = vpop.f32.mrf.mxu2 }
 0x3aa   : > { %v975_v9 = vadd.f32 %v1467_v4, %v974_v8 }
 0x3ac   : > { %v983_v10 = vmax.f32 %v975_v9, 0.0 }
 0x3ae   : > { %1121 = vst.msk [vmem:[%s552_s23 + $0x8] sm:$0xff] %vm642_vm3, %v983_v10 }
 0x3b1   : > { %v977_v11 = vpop.f32.mrf.mxu2 }
 0x3b2   : > { %v978_v12 = vadd.f32 %v1467_v4, %v977_v11 }
 0x3b4   : > { %v984_v13 = vmax.f32 %v978_v12, 0.0 }
 0x3b6   : > { %1122 = vst.msk [vmem:[%s552_s23 + $0x10] sm:$0xff] %vm642_vm3, %v984_v13 }
 0x3b9   : > { %v979_v14 = vpop.f32.mrf.mxu2 }
 0x3ba   : > { %v980_v15 = vadd.f32 %v1467_v4, %v979_v14 }
 0x3bc   : > { %v985_v16 = vmax.f32 %v980_v15, 0.0 }
 0x3be   : > { %1123 = vst.msk [vmem:[%s552_s23 + $0x18] sm:$0xff] %vm642_vm3, %v985_v16 }
 0x3bf   : > { %1543 = shalt.err (!%p1540_p3)
}
 0x3c0   : > { %s1581_s19 = smov 128   ;;  %s1582_s23 = smov 8  }
 0x3c1   : > { %1419 = dma.vmem_to_hbm [thread:$0]  (%p1714_p5), %s1157_s22, 512, %s1159_s1, %s1135_s26, %s1581_s19, %s1581_s19, %s1582_s23  }
 0x3c2 PF: > { %s1948_s2 = sld [smem:[#allocation6_spill]]  ;;  %p1425_p4 = scmp.ge.s32.totalorder %s1578_s29, 2 }
 0x3c4   : > { %p1422_p7 = pnand %p1425_p4, %p1718_p6 }
 0x3c6   : > { %p1423_p8 = pneg %p1422_p7 }
 0x3c8   : > { %s1185_s30 = sand.u32 1, %s1948_s2  }
 0x3c9   : > { %s1186_s25 = scalar_lea.sflag [#allocation4], %s1185_s30 }
 0x3ca   : > { %1561 = dma.done.wait (%p1423_p8), %s1186_s25, 512  }
 0x3cb   : > { %1563 = vsyncadd (%p1423_p8), %s1186_s25, 4294966784  ;;  %s1950_s29 = sld [smem:[#allocation8_spill]]  ;;  %s1953_s26 = smov %s1570_s27 }
 0x3cc   : > { %s1951_s28 = sld [smem:[#allocation7_spill]] }
 0x3cd   : > { %s1952_s14 = sld [smem:[#allocation9_spill]] }
 0x3d1   : > { %p30_p9 = scmp.ge.s32.totalorder %s1950_s29, 4  }
 0x3d2   : > { %s1954_s27 = smov %s1951_s28 }
 0x3d3   : > { %s1955_s28 = smov %s1952_s14  ;;  %32 = sbr.rel (!%p30_p9) target bundleno = 8 (0x8), region = 139 }
 0x3d8   :  { %1200 = vsyncpa [#allocation4], 1 }
 0x3d9   :  { %1202 = vsyncpa [#allocation4 + $0x1], 1 }

</bundles_post_ra>
